<compile_context>
chip_gen: v7x
topology: tpu7x:2x2x1
jax: 0.10.0
libtpu: 0.0.40
codegen_flags: <defaults>
</compile_context>

<pallas_src>
import functools
import math

import jax
import jax.numpy as jnp
from jax.experimental import pallas as pl
from jax.experimental.pallas import tpu as pltpu


def _round_up(a, b):
    return ((a + b - 1) // b) * b


# ----------------------------------------------------------------------------
# Fused kernel: one row-tile of the full GatedEquivariantBlock forward
# ----------------------------------------------------------------------------
def _geb_kernel(x_ref, v_ref, w12_ref, wu1_ref, bu1_ref, wu2_ref, bu2_ref,
                out_ref, *, H, O):
    w12 = w12_ref[...]                                   # (H, H+O): [vec1_proj | vec2_proj]
    p = [None] * 3                                       # vec1_proj(v)_d : (TN, H)
    q = [None] * 3                                       # vec2_proj(v)_d : (TN, O)
    for d in range(3):
        vd = v_ref[:, d * H:(d + 1) * H]                 # static lane slice of the (TN, 3H) tile
        pq = jnp.dot(vd, w12, preferred_element_type=jnp.float32)
        p[d] = pq[:, :H]
        q[d] = pq[:, H:]

    # vec1 = ||vec1_proj(v)||_2 over the 3 spatial components (torch.norm(dim=-2))
    vec1 = jnp.sqrt(p[0] * p[0] + p[1] * p[1] + p[2] * p[2])

    # update_net(cat([x, vec1], -1)) : Linear(2H->H) -> SiLU -> Linear(H->2O)
    xc = jnp.concatenate([x_ref[...], vec1], axis=-1)    # (TN, 2H)
    h = jnp.dot(xc, wu1_ref[...], preferred_element_type=jnp.float32) + bu1_ref[...]
    h = h * jax.nn.sigmoid(h)                            # SiLU
    u = jnp.dot(h, wu2_ref[...], preferred_element_type=jnp.float32) + bu2_ref[...]

    x_gate = u[:, :O]
    v_gate = u[:, O:]
    x_out = x_gate * jax.nn.sigmoid(x_gate)              # SiLU on the scalar branch
    # single lane-dense store: [ x_out | gate*vec2_d0 | gate*vec2_d1 | gate*vec2_d2 ]
    out_ref[...] = jnp.concatenate(
        [x_out, v_gate * q[0], v_gate * q[1], v_gate * q[2]], axis=-1)


# ----------------------------------------------------------------------------
# Wrapper
# ----------------------------------------------------------------------------
def gated_equivariant_block(x, v, params, *, block_rows=256):
    N, H = x.shape
    O = params['w_vec2'].shape[1]
    x = x.astype(jnp.float32)
    v_flat = v.astype(jnp.float32).reshape(N, 3 * H)     # free reshape, d-major lane blocks

    # vec1_proj / vec2_proj share the LHS -> concatenate their weights once.
    w12 = jnp.concatenate([params['w_vec1'].astype(jnp.float32),
                           params['w_vec2'].astype(jnp.float32)], axis=1)   # (H, H+O)
    wu1 = params['w_up1'].astype(jnp.float32)                               # (2H, H)
    bu1 = params['b_up1'].reshape(1, H).astype(jnp.float32)
    wu2 = params['w_up2'].astype(jnp.float32)                               # (H, 2O)
    bu2 = params['b_up2'].reshape(1, 2 * O).astype(jnp.float32)

    # 8-aligned row tiles; pad N up so every grid step sees a full tile.
    tn = block_rows if N >= block_rows else _round_up(N, 8)
    n_pad = _round_up(N, tn)
    if n_pad != N:
        x = jnp.pad(x, ((0, n_pad - N), (0, 0)))
        v_flat = jnp.pad(v_flat, ((0, n_pad - N), (0, 0)))
    grid = (pl.cdiv(n_pad, tn),)

    def row_spec(cols):
        return pl.BlockSpec((tn, cols), lambda i: (i, 0))

    def full_spec(shape):
        return pl.BlockSpec(shape, lambda i: (0, 0))

    out = pl.pallas_call(
        functools.partial(_geb_kernel, H=H, O=O),
        grid=grid,
        in_specs=[row_spec(H), row_spec(3 * H),
                  full_spec((H, H + O)),
                  full_spec((2 * H, H)), full_spec((1, H)),
                  full_spec((H, 2 * O)), full_spec((1, 2 * O))],
        out_specs=row_spec(4 * O),
        out_shape=jax.ShapeDtypeStruct((n_pad, 4 * O), jnp.float32),
        compiler_params=pltpu.CompilerParams(
            dimension_semantics=("parallel",)),
    )(x, v_flat, w12, wu1, bu1, wu2, bu2)

    out = out[:N]
    x_out = out[:, :O]
    v_out = out[:, O:].reshape(N, 3, O)
    return x_out, v_out


# ----------------------------------------------------------------------------
# Parameter init (matches torch reset_parameters: xavier_uniform weights, zero bias)
# Weights stored in "right-multiply" layout: y = x @ W.
# ----------------------------------------------------------------------------
def _xavier(key, shape):
    limit = math.sqrt(6.0 / (shape[0] + shape[1]))
    return jax.random.uniform(key, shape, jnp.float32, -limit, limit)


def init_params(key, H, O):
    k1, k2, k3, k4 = jax.random.split(key, 4)
    return {
        'w_vec1': _xavier(k1, (H, H)),          # vec1_proj (no bias)
        'w_vec2': _xavier(k2, (H, O)),          # vec2_proj (no bias)
        'w_up1': _xavier(k3, (2 * H, H)),       # update_net[0]
        'b_up1': jnp.zeros((H,), jnp.float32),
        'w_up2': _xavier(k4, (H, 2 * O)),       # update_net[2]
        'b_up2': jnp.zeros((2 * O,), jnp.float32),
    }


# ----------------------------------------------------------------------------
# Pure-JAX reference (mirrors the PyTorch forward) for a correctness check
# ----------------------------------------------------------------------------
def reference_forward(x, v, params):
    O = params['w_vec2'].shape[1]
    p = jnp.einsum('ndh,hk->ndk', v, params['w_vec1'])
    vec1 = jnp.sqrt(jnp.sum(p * p, axis=1))
    vec2 = jnp.einsum('ndh,hk->ndk', v, params['w_vec2'])
    xc = jnp.concatenate([x, vec1], axis=-1)
    h = xc @ params['w_up1'] + params['b_up1']
    h = h * jax.nn.sigmoid(h)
    u = h @ params['w_up2'] + params['b_up2']
    x_o, gate = u[:, :O], u[:, O:]
    return x_o * jax.nn.sigmoid(x_o), gate[:, None, :] * vec2


if __name__ == "__main__":
    H, O = 32, 32          # hidden_channels, out_channels (4*O = 128 -> lane-dense output tile)
    N = 10                 # nodes; exercises the 8-aligned row-padding path

    key = jax.random.PRNGKey(0)
    kx, kv, kp = jax.random.split(key, 3)
    x = jax.random.normal(kx, (N, H), jnp.float32)
    v = jax.random.normal(kv, (N, 3, H), jnp.float32)
    params = init_params(kp, H, O)

    fwd = jax.jit(gated_equivariant_block)
    x_out, v_out = fwd(x, v, params)
    x_out, v_out = jax.block_until_ready((x_out, v_out))

    x_ref, v_ref = reference_forward(x, v, params)
    assert x_out.shape == (N, O) and v_out.shape == (N, 3, O)
    assert bool(jnp.all(jnp.isfinite(x_out))) and bool(jnp.all(jnp.isfinite(v_out)))
    assert bool(jnp.allclose(x_out, x_ref, atol=1e-3, rtol=1e-3))
    assert bool(jnp.allclose(v_out, v_ref, atol=1e-3, rtol=1e-3))
    print("KERNEL_OK")
</pallas_src>

<mosaic_0001>
module attributes {stable_mosaic.version = 11 : i64} {
  func.func @_geb_kernel(%arg0: i32, %arg1: memref<16x32xf32, #tpu.memory_space<vmem>>, %arg2: memref<16x96xf32, #tpu.memory_space<vmem>>, %arg3: memref<32x64xf32, #tpu.memory_space<vmem>>, %arg4: memref<64x32xf32, #tpu.memory_space<vmem>>, %arg5: memref<1x32xf32, #tpu.memory_space<vmem>>, %arg6: memref<32x64xf32, #tpu.memory_space<vmem>>, %arg7: memref<1x64xf32, #tpu.memory_space<vmem>>, %arg8: memref<16x128xf32, #tpu.memory_space<vmem>>) attributes {dimension_semantics = [#tpu.dimension_semantics<parallel>], iteration_bounds = array<i64: 1>, scalar_prefetch = 0 : i64, scratch_operands = 0 : i64, tpu.core_type = #tpu.core_type<tc>, window_params = [{transform_indices = @transform_0, window_bounds = array<i64: 16, 32>}, {transform_indices = @transform_1, window_bounds = array<i64: 16, 96>}, {pipeline_mode = #tpu.pipeline_mode<synchronous>, transform_indices = @transform_2, window_bounds = array<i64: 32, 64>}, {pipeline_mode = #tpu.pipeline_mode<synchronous>, transform_indices = @transform_3, window_bounds = array<i64: 64, 32>}, {pipeline_mode = #tpu.pipeline_mode<synchronous>, transform_indices = @transform_4, window_bounds = array<i64: 1, 32>}, {pipeline_mode = #tpu.pipeline_mode<synchronous>, transform_indices = @transform_5, window_bounds = array<i64: 32, 64>}, {pipeline_mode = #tpu.pipeline_mode<synchronous>, transform_indices = @transform_6, window_bounds = array<i64: 1, 64>}, {transform_indices = @transform_7, window_bounds = array<i64: 16, 128>}]} {
    %c0 = arith.constant 0 : index
    %c0_0 = arith.constant 0 : index
    %0 = vector.load %arg3[%c0, %c0_0] : memref<32x64xf32, #tpu.memory_space<vmem>>, vector<32x64xf32>
    %c0_1 = arith.constant 0 : index
    %c0_2 = arith.constant 0 : index
    %1 = vector.load %arg2[%c0_1, %c0_2] : memref<16x96xf32, #tpu.memory_space<vmem>>, vector<16x32xf32>
    %cst = arith.constant dense<0.000000e+00> : vector<16x64xf32>
    %2 = tpu.matmul %1, %0, %cst {dimension_numbers = #tpu.dot_dimension_numbers<[1], [0], [0], [1], [0, 0, 1, 1], [], []>} : vector<16x32xf32>, vector<32x64xf32>, vector<16x64xf32> -> vector<16x64xf32>
    %3 = vector.extract_strided_slice %2 {offsets = [0, 0], sizes = [16, 32], strides = [1, 1]} : vector<16x64xf32> to vector<16x32xf32>
    %4 = vector.extract_strided_slice %2 {offsets = [0, 32], sizes = [16, 32], strides = [1, 1]} : vector<16x64xf32> to vector<16x32xf32>
    %c0_3 = arith.constant 0 : index
    %c32 = arith.constant 32 : index
    %5 = vector.load %arg2[%c0_3, %c32] : memref<16x96xf32, #tpu.memory_space<vmem>>, vector<16x32xf32>
    %cst_4 = arith.constant dense<0.000000e+00> : vector<16x64xf32>
    %6 = tpu.matmul %5, %0, %cst_4 {dimension_numbers = #tpu.dot_dimension_numbers<[1], [0], [0], [1], [0, 0, 1, 1], [], []>} : vector<16x32xf32>, vector<32x64xf32>, vector<16x64xf32> -> vector<16x64xf32>
    %7 = vector.extract_strided_slice %6 {offsets = [0, 0], sizes = [16, 32], strides = [1, 1]} : vector<16x64xf32> to vector<16x32xf32>
    %8 = vector.extract_strided_slice %6 {offsets = [0, 32], sizes = [16, 32], strides = [1, 1]} : vector<16x64xf32> to vector<16x32xf32>
    %c0_5 = arith.constant 0 : index
    %c64 = arith.constant 64 : index
    %9 = vector.load %arg2[%c0_5, %c64] : memref<16x96xf32, #tpu.memory_space<vmem>>, vector<16x32xf32>
    %cst_6 = arith.constant dense<0.000000e+00> : vector<16x64xf32>
    %10 = tpu.matmul %9, %0, %cst_6 {dimension_numbers = #tpu.dot_dimension_numbers<[1], [0], [0], [1], [0, 0, 1, 1], [], []>} : vector<16x32xf32>, vector<32x64xf32>, vector<16x64xf32> -> vector<16x64xf32>
    %11 = vector.extract_strided_slice %10 {offsets = [0, 0], sizes = [16, 32], strides = [1, 1]} : vector<16x64xf32> to vector<16x32xf32>
    %12 = vector.extract_strided_slice %10 {offsets = [0, 32], sizes = [16, 32], strides = [1, 1]} : vector<16x64xf32> to vector<16x32xf32>
    %13 = arith.mulf %3, %3 : vector<16x32xf32>
    %14 = arith.mulf %7, %7 : vector<16x32xf32>
    %15 = arith.addf %13, %14 : vector<16x32xf32>
    %16 = arith.mulf %11, %11 : vector<16x32xf32>
    %17 = arith.addf %15, %16 : vector<16x32xf32>
    %18 = math.sqrt %17 : vector<16x32xf32>
    %c0_7 = arith.constant 0 : index
    %c0_8 = arith.constant 0 : index
    %19 = vector.load %arg1[%c0_7, %c0_8] : memref<16x32xf32, #tpu.memory_space<vmem>>, vector<16x32xf32>
    %20 = tpu.concatenate %19, %18 in 1 : vector<16x32xf32>, vector<16x32xf32> -> vector<16x64xf32>
    %c0_9 = arith.constant 0 : index
    %c0_10 = arith.constant 0 : index
    %21 = vector.load %arg4[%c0_9, %c0_10] : memref<64x32xf32, #tpu.memory_space<vmem>>, vector<64x32xf32>
    %cst_11 = arith.constant dense<0.000000e+00> : vector<16x32xf32>
    %22 = tpu.matmul %20, %21, %cst_11 {dimension_numbers = #tpu.dot_dimension_numbers<[1], [0], [0], [1], [0, 0, 1, 1], [], []>} : vector<16x64xf32>, vector<64x32xf32>, vector<16x32xf32> -> vector<16x32xf32>
    %c0_12 = arith.constant 0 : index
    %c0_13 = arith.constant 0 : index
    %23 = vector.load %arg5[%c0_12, %c0_13] : memref<1x32xf32, #tpu.memory_space<vmem>>, vector<1x32xf32>
    %24 = vector.broadcast %23 : vector<1x32xf32> to vector<16x32xf32>
    %25 = arith.addf %22, %24 : vector<16x32xf32>
    %26 = arith.negf %25 : vector<16x32xf32>
    %27 = math.exp %26 : vector<16x32xf32>
    %cst_14 = arith.constant 1.000000e+00 : f32
    %28 = vector.broadcast %cst_14 : f32 to vector<16x32xf32>
    %29 = arith.addf %28, %27 : vector<16x32xf32>
    %30 = arith.divf %28, %29 : vector<16x32xf32>
    %31 = arith.mulf %25, %30 : vector<16x32xf32>
    %c0_15 = arith.constant 0 : index
    %c0_16 = arith.constant 0 : index
    %32 = vector.load %arg6[%c0_15, %c0_16] : memref<32x64xf32, #tpu.memory_space<vmem>>, vector<32x64xf32>
    %cst_17 = arith.constant dense<0.000000e+00> : vector<16x64xf32>
    %33 = tpu.matmul %31, %32, %cst_17 {dimension_numbers = #tpu.dot_dimension_numbers<[1], [0], [0], [1], [0, 0, 1, 1], [], []>} : vector<16x32xf32>, vector<32x64xf32>, vector<16x64xf32> -> vector<16x64xf32>
    %c0_18 = arith.constant 0 : index
    %c0_19 = arith.constant 0 : index
    %34 = vector.load %arg7[%c0_18, %c0_19] : memref<1x64xf32, #tpu.memory_space<vmem>>, vector<1x64xf32>
    %35 = vector.broadcast %34 : vector<1x64xf32> to vector<16x64xf32>
    %36 = arith.addf %33, %35 : vector<16x64xf32>
    %37 = vector.extract_strided_slice %36 {offsets = [0, 0], sizes = [16, 32], strides = [1, 1]} : vector<16x64xf32> to vector<16x32xf32>
    %38 = vector.extract_strided_slice %36 {offsets = [0, 32], sizes = [16, 32], strides = [1, 1]} : vector<16x64xf32> to vector<16x32xf32>
    %39 = arith.negf %37 : vector<16x32xf32>
    %40 = math.exp %39 : vector<16x32xf32>
    %cst_20 = arith.constant 1.000000e+00 : f32
    %41 = vector.broadcast %cst_20 : f32 to vector<16x32xf32>
    %42 = arith.addf %41, %40 : vector<16x32xf32>
    %43 = arith.divf %41, %42 : vector<16x32xf32>
    %44 = arith.mulf %37, %43 : vector<16x32xf32>
    %45 = arith.mulf %38, %4 : vector<16x32xf32>
    %46 = arith.mulf %38, %8 : vector<16x32xf32>
    %47 = arith.mulf %38, %12 : vector<16x32xf32>
    %48 = tpu.concatenate %44, %45, %46, %47 in 1 : vector<16x32xf32>, vector<16x32xf32>, vector<16x32xf32>, vector<16x32xf32> -> vector<16x128xf32>
    %c0_21 = arith.constant 0 : index
    %c0_22 = arith.constant 0 : index
    %49 = vector.load %arg8[%c0_21, %c0_22] : memref<16x128xf32, #tpu.memory_space<vmem>>, vector<16x128xf32>
    tpu.vector_store %arg8[%c0_21, %c0_22], %48 {strides = array<i32>} : memref<16x128xf32, #tpu.memory_space<vmem>>, vector<16x128xf32>,
    return
  }
  func.func @transform_0(%arg0: i32) -> (i32, i32) {
    %c0_i32 = arith.constant 0 : i32
    %c0_i32_0 = arith.constant 0 : i32
    return %arg0, %c0_i32 : i32, i32
  }
  func.func @transform_1(%arg0: i32) -> (i32, i32) {
    %c0_i32 = arith.constant 0 : i32
    %c0_i32_0 = arith.constant 0 : i32
    return %arg0, %c0_i32 : i32, i32
  }
  func.func @transform_2(%arg0: i32) -> (i32, i32) {
    %c0_i32 = arith.constant 0 : i32
    %c0_i32_0 = arith.constant 0 : i32
    %c0_i32_1 = arith.constant 0 : i32
    return %c0_i32, %c0_i32_0 : i32, i32
  }
  func.func @transform_3(%arg0: i32) -> (i32, i32) {
    %c0_i32 = arith.constant 0 : i32
    %c0_i32_0 = arith.constant 0 : i32
    %c0_i32_1 = arith.constant 0 : i32
    return %c0_i32, %c0_i32_0 : i32, i32
  }
  func.func @transform_4(%arg0: i32) -> (i32, i32) {
    %c0_i32 = arith.constant 0 : i32
    %c0_i32_0 = arith.constant 0 : i32
    %c0_i32_1 = arith.constant 0 : i32
    return %c0_i32, %c0_i32_0 : i32, i32
  }
  func.func @transform_5(%arg0: i32) -> (i32, i32) {
    %c0_i32 = arith.constant 0 : i32
    %c0_i32_0 = arith.constant 0 : i32
    %c0_i32_1 = arith.constant 0 : i32
    return %c0_i32, %c0_i32_0 : i32, i32
  }
  func.func @transform_6(%arg0: i32) -> (i32, i32) {
    %c0_i32 = arith.constant 0 : i32
    %c0_i32_0 = arith.constant 0 : i32
    %c0_i32_1 = arith.constant 0 : i32
    return %c0_i32, %c0_i32_0 : i32, i32
  }
  func.func @transform_7(%arg0: i32) -> (i32, i32) {
    %c0_i32 = arith.constant 0 : i32
    %c0_i32_0 = arith.constant 0 : i32
    return %arg0, %c0_i32 : i32, i32
  }
}

</mosaic_0001>

<bundles_post_ra>
// kernel: gated_equivariant_block.1
= control target key start
LH: loop header
LB: loop body
LE: loop exit
PB: predicated region body
PF: predicated region fallthrough
CT: control target
= control target key end

     0   :  { %vm32_vm0 = vcmask 261120   ;;  %s752_s28 = smov 96   ;;  %s753_s29 = smov 64   ;;  %vm331_vm5 = vcmask 523264   ;;  %vm559_vm6 = vcmask 785408   ;;  %s921_s1 = inlined_call_operand.vmem [shape: f32[16,96], index: 1, kind: input, shape index: {}]   ;;  %s922_s2 = inlined_call_operand.vmem [shape: f32[32,64], index: 2, kind: input, shape index: {}]   ;;  %s923_s3 = inlined_call_operand.vmem [shape: f32[64,32], index: 3, kind: input, shape index: {}]   ;;  %s924_s0 = inlined_call_operand.vmem [shape: f32[16,32], index: 0, kind: input, shape index: {}]   ;;  %s925_s5 = inlined_call_operand.vmem [shape: f32[32,64], index: 5, kind: input, shape index: {}]   ;;  %s926_s4 = inlined_call_operand.vmem [shape: f32[1,32], index: 4, kind: input, shape index: {}]   ;;  %s927_s6 = inlined_call_operand.vmem [shape: f32[1,64], index: 6, kind: input, shape index: {}]   ;;  %s928_s7 = inlined_call_operand.vmem [shape: f32[16,128], index: 7, kind: output, shape index: {}]  }
   0x1   :  { %v30_v0 = vld [vmem:[%s921_s1] sm:$0xff]  ;;  %v27_v2 = vld [vmem:[%s922_s2 + $0x8] sm:$0xff]  ;;  %v28_v3 = vld [vmem:[%s922_s2 + $0x10] sm:$0xff] }
   0x2   :  { %v26_v1 = vld [vmem:[%s922_s2] sm:$0xff]  ;;  %114 = vrot.lane.b32.xlu0 %v30_v0, %s752_s28  ;;  %197 = vrot.lane.b32.xlu1 %v30_v0, %s753_s29  ;;  %v31_v4 = vld [vmem:[%s921_s1 + $0x8] sm:$0xff] }
   0x3   :  { %v681_v5 = vpack.c.bf16 %v27_v2, %v26_v1  ;;  %v29_v6 = vld [vmem:[%s922_s2 + $0x18] sm:$0xff]  ;;  %626 = vmatprep.mubr.msk.f32.mxu0 %vm32_vm0, %v30_v0  ;;  %v316_v14 = vld [vmem:[%s923_s3] sm:$0xff]  ;;  %v317_v15 = vld [vmem:[%s923_s3 + $0x8] sm:$0xff] }
   0x4   :  { %v685_v7 = vpack.c.bf16 %v29_v6, %v28_v3  ;;  %v318_v16 = vld [vmem:[%s923_s3 + $0x10] sm:$0xff]  ;;  %v705_v17 = vpack.c.bf16 %v317_v15, %v316_v14  ;;  %v319_v18 = vld [vmem:[%s923_s3 + $0x18] sm:$0xff]  ;;  %v320_v20 = vld [vmem:[%s923_s3 + $0x20] sm:$0xff] }
   0x5   :  { %682 = vmatprep.subr.bf16.mxu0 %v681_v5  ;;  %690 = vmatprep.subr.bf16.mxu1 %v681_v5  ;;  %v709_v19 = vpack.c.bf16 %v319_v18, %v318_v16  ;;  %v321_v21 = vld [vmem:[%s923_s3 + $0x28] sm:$0xff]  ;;  %v322_v23 = vld [vmem:[%s923_s3 + $0x30] sm:$0xff]  ;;  %v323_v24 = vld [vmem:[%s923_s3 + $0x38] sm:$0xff]  ;;  %s754_s3 = smov 32  }
   0x6   :  { %116 = vrot.lane.b32.xlu0 %v31_v4, %s752_s28  ;;  %199 = vrot.lane.b32.xlu1 %v31_v4, %s753_s29  ;;  %v713_v22 = vpack.c.bf16 %v321_v21, %v320_v20  ;;  %v717_v25 = vpack.c.bf16 %v323_v24, %v322_v23  ;;  %v304_v50 = vld [vmem:[%s924_s0] sm:$0xff]  ;;  %v305_v52 = vld [vmem:[%s924_s0 + $0x8] sm:$0xff] }
   0x7   :  { %684 = vmatpush3.bf16.msra.mxu0 %v681_v5  ;;  %692 = vmatpush3.bf16.msra.mxu1 %v681_v5  ;;  %v427_v56 = vld [vmem:[%s925_s5] sm:$0xff]  ;;  %v428_v57 = vld [vmem:[%s925_s5 + $0x8] sm:$0xff]  ;;  %v429_v59 = vld [vmem:[%s925_s5 + $0x10] sm:$0xff] }
   0x8   :  { %686 = vmatprep.subr.bf16.mxu0 %v685_v7  ;;  %694 = vmatprep.subr.bf16.mxu1 %v685_v7  ;;  %v721_v58 = vpack.c.bf16 %v428_v57, %v427_v56  ;;  %v430_v60 = vld [vmem:[%s925_s5 + $0x18] sm:$0xff]  ;;  %v574_v62 = vld [vmem:[%s926_s4] ss:$0 sm:$0xff] }
   0x9   :  { %v725_v61 = vpack.c.bf16 %v430_v60, %v429_v59  ;;  %v579_v15 = vld [vmem:[%s927_s6] ss:$0 sm:$0xff] }
   0xb   :  { %688 = vmatpush3.bf16.msra.mxu0 %v685_v7  ;;  %696 = vmatpush3.bf16.msra.mxu1 %v685_v7 }
   0xc   :  { %698 = vmatprep.subr.bf16.mxu0 %v681_v5  ;;  %706 = vmatprep.subr.bf16.mxu1 %v705_v17 }
   0xe   :  { %627 = vmatmul.mubr.msk.f32.vlgmr.msra.gmra.mrb[0].mxu0 %vm32_vm0, %v31_v4 }
   0xf   :  { %700 = vmatpush3.bf16.msra.mxu0 %v681_v5 }
  0x10   :  { %702 = vmatprep.subr.bf16.mxu0 %v685_v7 }
  0x13   :  { %704 = vmatpush3.bf16.msra.mxu0 %v685_v7 }
  0x14   :  { %722 = vmatprep.subr.bf16.mxu0 %v721_v58 }
  0x74   :  { %v115_v8 = vpop.permute.xlu0 %114  ;;  %v198_v9 = vpop.permute.xlu1 %197 }
  0x75   :  { %637 = vmatprep.mubr.msk.f32.mxu1 %vm32_vm0, %v115_v8  ;;  %648 = vmatprep.mubr.msk.f32.mxu0 %vm32_vm0, %v198_v9 }
  0x78   :  { %v117_v10 = vpop.permute.xlu0 %116  ;;  %v200_v11 = vpop.permute.xlu1 %199 }
  0x79   :  { %638 = vmatmul.mubr.msk.f32.vlgmr.msra.gmra.mrb[0].mxu1 %vm32_vm0, %v117_v10  ;;  %649 = vmatmul.mubr.msk.f32.vlgmr.msra.gmra.mrb[2].mxu0 %vm32_vm0, %v200_v11 }
  0x7a   :  { %708 = vmatpush3.bf16.msra.mxu1 %v705_v17  ;;  %724 = vmatpush3.bf16.msra.mxu0 %v721_v58 }
  0x7b   :  { %710 = vmatprep.subr.bf16.mxu1 %v709_v19  ;;  %726 = vmatprep.subr.bf16.mxu0 %v725_v61 }
  0x7e   :  { %712 = vmatpush3.bf16.msra.mxu1 %v709_v19  ;;  %728 = vmatpush3.bf16.msra.mxu0 %v725_v61 }
  0x7f   :  { %714 = vmatprep.subr.bf16.mxu1 %v713_v22 }
  0x82   :  { %716 = vmatpush3.bf16.msra.mxu1 %v713_v22 }
  0x83   :  { %718 = vmatprep.subr.bf16.mxu1 %v717_v25 }
  0x86   :  { %720 = vmatpush3.bf16.msra.mxu1 %v717_v25 }
  0xe1   :  { %v821_v12 = vpop.f32.mrb[0].mxu0 }
  0xe2   :  { %v823_v13 = vpop.f32.mrb[1].mxu0  ;;  %v281_v28 = vmul.f32 %v821_v12, %v821_v12 }
  0xe3   :  { %v280_v33 = vmul.f32 %v823_v13, %v823_v13 }
 0x14c   :  { %v849_v26 = vpop.f32.mrb[0].mxu1  ;;  %v851_v27 = vpop.f32.mrb[2].mxu0 }
 0x14d   :  { %v283_v29 = vmul.f32 %v849_v26, %v849_v26  ;;  %v857_v30 = vpop.f32.mrb[1].mxu1  ;;  %v287_v31 = vmul.f32 %v851_v27, %v851_v27  ;;  %v861_v32 = vpop.f32.mrb[3].mxu0 }
 0x14e   :  { %v282_v34 = vmul.f32 %v857_v30, %v857_v30  ;;  %v286_v35 = vmul.f32 %v861_v32, %v861_v32 }
 0x14f   :  { %v285_v36 = vadd.f32 %v283_v29, %v281_v28 }
 0x150   :  { %v284_v37 = vadd.f32 %v282_v34, %v280_v33 }
 0x151   :  { %v289_v38 = vadd.f32 %v287_v31, %v285_v36 }
 0x152   :  { %v288_v39 = vadd.f32 %v286_v35, %v284_v37 }
 0x153   :  { %732 = vrsqrt.f32 %v289_v38  ;;  %vm299_vm1 = vcmp.eq.f32.partialorder %v289_v38, inf  ;;  %v302_v43 = vand.u32 2147483648, %v289_v38  ;;  %vm301_vm2 = vcmp.eq.f32.partialorder %v289_v38, 0.0 }
 0x154   :  { %734 = vrsqrt.f32 %v288_v39  ;;  %vm292_vm3 = vcmp.eq.f32.partialorder %v288_v39, inf  ;;  %v295_v46 = vand.u32 2147483648, %v288_v39  ;;  %vm294_vm4 = vcmp.eq.f32.partialorder %v288_v39, 0.0 }
 0x15d   :  { %v733_v40 = vpop.eup %732 }
 0x15e   :  { %v735_v41 = vpop.eup %734  ;;  %v298_v42 = vmul.f32 %v733_v40, %v289_v38 }
 0x15f   :  { %v291_v44 = vmul.f32 %v735_v41, %v288_v39 }
 0x160   :  { %v300_v45 = vsel %vm299_vm1, %v289_v38, %v298_v42 }
 0x161   :  { %v303_v47 = vsel %vm301_vm2, %v302_v43, %v300_v45  ;;  %v293_v48 = vsel %vm292_vm3, %v288_v39, %v291_v44 }
 0x162   :  { %310 = vrot.lane.b32.xlu1 %v303_v47, %s754_s3  ;;  %v296_v49 = vsel %vm294_vm4, %v295_v46, %v293_v48 }
 0x163   :  { %308 = vrot.lane.b32.xlu0 %v296_v49, %s754_s3 }
 0x1d4   :  { %v311_v51 = vpop.permute.xlu1 %310 }
 0x1d5   :  { %v309_v53 = vpop.permute.xlu0 %308  ;;  %v315_v55 = vsel %vm32_vm0, %v305_v52, %v311_v51 }
 0x1d6   :  { %v314_v54 = vsel %vm32_vm0, %v304_v50, %v309_v53 }
 0x1d7   :  { %667 = vmatprep.mubr.msk.f32.mxu1 %vm331_vm5, %v314_v54 }
 0x1d8   :  { %668 = vmatmul.mubr.msk.f32.vlgmr.msra.gmra.mrb[2].mxu1 %vm331_vm5, %v315_v55 }
 0x2ab   :  { %v669_v63 = vpop.f32.mrb[2].mxu1 }
 0x2ac   :  { %v410_v0 = vadd.f32 %v669_v63, %v574_v62  ;;  %v404_v1 = vpop.f32.mrb[3].mxu1 }
 0x2ad   :  { %v405_v2 = vadd.f32 %v574_v62, %v404_v1 }
 0x2ae   :  { %v578_v3 = vmul.f32 -1.442695, %v410_v0 }
 0x2af   :  { %v577_v4 = vmul.f32 -1.442695, %v405_v2 }
 0x2b0   :  { %736 = vpow2.f32 %v578_v3 }
 0x2b1   :  { %738 = vpow2.f32 %v577_v4 }
 0x2ba   :  { %v737_v5 = vpop.eup %736 }
 0x2bb   :  { %v739_v6 = vpop.eup %738  ;;  %v420_v7 = vadd.f32 1.0, %v737_v5 }
 0x2bc   :  { %v419_v8 = vadd.f32 1.0, %v739_v6 }
 0x2bd   :  { %740 = vrcp.f32 %v420_v7 }
 0x2be   :  { %742 = vrcp.f32 %v419_v8 }
 0x2c7   :  { %v741_v9 = vpop.eup %740 }
 0x2c8   :  { %v743_v10 = vpop.eup %742  ;;  %v426_v14 = vmul.f32 %v741_v9, %v410_v0 }
 0x2c9   :  { %v425_v11 = vmul.f32 %v743_v10, %v405_v2 }
 0x2cb   :  { %678 = vmatprep.mubr.msk.f32.mxu0 %vm32_vm0, %v425_v11 }
 0x2cc   :  { %679 = vmatmul.mubr.msk.f32.vlgmr.msra.gmra.mrb[4].mxu0 %vm32_vm0, %v426_v14 }
 0x39f   :  { %v680_v16 = vpop.f32.mrb[4].mxu0 }
 0x3a0   :  { %v516_v17 = vadd.f32 %v680_v16, %v579_v15  ;;  %v510_v18 = vpop.f32.mrb[5].mxu0 }
 0x3a1   :  { %v511_v19 = vadd.f32 %v579_v15, %v510_v18 }
 0x3a2   :  { %v583_v20 = vmul.f32 -1.442695, %v516_v17  ;;  %v536_v21 = vmul.f32 %v849_v26, %v516_v17  ;;  %v538_v22 = vmul.f32 %v851_v27, %v516_v17  ;;  %v534_v23 = vmul.f32 %v821_v12, %v516_v17 }
 0x3a3   :  { %v582_v24 = vmul.f32 -1.442695, %v511_v19  ;;  %v535_v25 = vmul.f32 %v511_v19, %v857_v30  ;;  %v537_v28 = vmul.f32 %v511_v19, %v861_v32  ;;  %v533_v29 = vmul.f32 %v511_v19, %v823_v13 }
 0x3a4   :  { %744 = vpow2.f32 %v583_v20  ;;  %543 = vrot.lane.b32.xlu1 %v536_v21, %s754_s3 }
 0x3a5   :  { %746 = vpow2.f32 %v582_v24  ;;  %541 = vrot.lane.b32.xlu0 %v535_v25, %s754_s3 }
 0x3a8   :  { %551 = vrot.lane.b32.xlu1 %v538_v22, %s753_s29 }
 0x3a9   :  { %549 = vrot.lane.b32.xlu0 %v537_v28, %s753_s29 }
 0x3ae   :  { %v745_v26 = vpop.eup %744 }
 0x3af   :  { %v747_v27 = vpop.eup %746  ;;  %v526_v12 = vadd.f32 1.0, %v745_v26 }
 0x3b0   :  { %v525_v31 = vadd.f32 1.0, %v747_v27 }
 0x3b1   :  { %748 = vrcp.f32 %v526_v12 }
 0x3b2   :  { %750 = vrcp.f32 %v525_v31 }
 0x3bb   :  { %v749_v30 = vpop.eup %748 }
 0x3bc   :  { %v751_v32 = vpop.eup %750  ;;  %v532_v33 = vmul.f32 %v749_v30, %v516_v17 }
 0x3bd   :  { %v531_v13 = vmul.f32 %v751_v32, %v511_v19 }
 0x3be   :  { %v556_v34 = vsel %vm32_vm0, %v532_v33, %v534_v23 }
 0x3bf   :  { %v555_v35 = vsel %vm32_vm0, %v531_v13, %v533_v29 }
 0x416   :  { %v544_v36 = vpop.permute.xlu1 %543 }
 0x417   :  { %v542_v37 = vpop.permute.xlu0 %541  ;;  %v558_v38 = vsel %vm331_vm5, %v556_v34, %v544_v36 }
 0x418   :  { %v557_v40 = vsel %vm331_vm5, %v555_v35, %v542_v37 }
 0x41a   :  { %v552_v39 = vpop.permute.xlu1 %551 }
 0x41b   :  { %v561_v41 = vsel %vm559_vm6, %v558_v38, %v552_v39  ;;  %v550_v42 = vpop.permute.xlu0 %549 }
 0x41c   :  { %563 = vst [vmem:[%s928_s7 + $0x8] sm:$0xff] %v561_v41  ;;  %v560_v43 = vsel %vm559_vm6, %v557_v40, %v550_v42 }
 0x41d   :  { %562 = vst [vmem:[%s928_s7] sm:$0xff] %v560_v43 }

</bundles_post_ra>
